<compile_context>
chip_gen: v7x
topology: tpu7x:2x2x1
jax: 0.10.0
libtpu: 0.0.40
codegen_flags: <defaults>
</compile_context>

<pallas_src>
import jax
import jax.numpy as jnp
from jax.experimental import pallas as pl
from jax.experimental.pallas import tpu as pltpu

H1, H2 = 400, 300          # true hidden sizes (PyTorch spec)
H1P, H2P = 512, 384        # lane-padded hidden sizes (multiples of 128)


def _round_up(x, m):
    return (x + m - 1) // m * m


def critic_kernel(xu_ref, w1_ref, b1_ref, w2_ref, b2_ref, w3_ref, b3_ref,
                  out_ref):
    # Layer 1: bf16 operands into the MXU, f32 accumulation; bias+ReLU in f32.
    h1 = jnp.dot(xu_ref[...], w1_ref[...],
                 preferred_element_type=jnp.float32)
    h1 = jnp.maximum(h1 + b1_ref[...], 0.0)

    # Layer 2: cast the activation to bf16 only at the MXU input.
    h2 = jnp.dot(h1.astype(jnp.bfloat16), w2_ref[...],
                 preferred_element_type=jnp.float32)
    h2 = jnp.maximum(h2 + b2_ref[...], 0.0)

    # Layer 3: H2P -> 1 as a VPU multiply + lane reduction in f32 (an N=1
    # matmul would use <1% of the MXU columns).  w3 is a (1, H2P) f32 row;
    # b3 is an SMEM scalar.
    q = jnp.sum(h2 * w3_ref[...], axis=-1, keepdims=True) + b3_ref[0, 0]
    out_ref[...] = q.astype(out_ref.dtype)


def critic_forward(x, u, kernel_params, *, tb=2048, vmem_limit_bytes=None):
    """x: (B, state_dim) f32, u: (B, action_dim) f32 -> (B, 1) f32."""
    w1, b1, w2, b2, w3, b3 = kernel_params
    B = x.shape[0]
    # Concatenate once and cast to bf16 on the XLA side: halves xu DMA bytes
    # and is numerically identical to casting inside the kernel.
    xu = jnp.concatenate([x, u], axis=1).astype(jnp.bfloat16)
    K = xu.shape[1]

    if B <= 256:
        # Tiny-batch / latency case: one tile, padded only to a sublane multiple.
        tb_eff = _round_up(B, 8)
    else:
        # Keep at least 2 grid programs so both v7x TensorCores get work
        # (dimension_semantics=("parallel",) shards the batch axis), but never
        # exceed the requested tile size.
        tb_eff = min(tb, _round_up(pl.cdiv(B, 2), 128))
    Bp = _round_up(B, tb_eff)
    if Bp != B:
        xu = jnp.pad(xu, ((0, Bp - B), (0, 0)))   # zero rows, sliced off below
    grid = (Bp // tb_eff,)

    if vmem_limit_bytes is None:
        # ~16 KiB/row covers h1/h2 f32 scratch, the bf16 h1 copy and the
        # double-buffered xu/out tiles with margin; the clamp keeps the request
        # above v5e's 16 MiB default scoped limit and inside v7x's 64 MiB
        # physical VMEM.
        vmem_limit_bytes = int(min(56 << 20, max(24 << 20, tb_eff * (16 << 10))))

    # Weights/biases: constant index_map -> DMA'd once, resident in VMEM.
    resident = lambda a: pl.BlockSpec(a.shape, lambda i: (0,) * a.ndim)

    out = pl.pallas_call(
        critic_kernel,
        out_shape=jax.ShapeDtypeStruct((Bp, 1), jnp.float32),
        grid=grid,
        in_specs=[
            pl.BlockSpec((tb_eff, K), lambda i: (i, 0)),        # xu: batch-tiled
            resident(w1), resident(b1),
            resident(w2), resident(b2),
            resident(w3),
            pl.BlockSpec(memory_space=pltpu.MemorySpace.SMEM),  # b3 scalar
        ],
        out_specs=pl.BlockSpec((tb_eff, 1), lambda i: (i, 0)),
        compiler_params=pltpu.CompilerParams(
            dimension_semantics=("parallel",),
            vmem_limit_bytes=vmem_limit_bytes),
    )(xu, w1, b1, w2, b2, w3, b3)
    return out[:B]


def init_params(key, state_dim, action_dim):
    """Deterministic synthetic parameters at true PyTorch shapes (transposed:
    weights stored as (in_features, out_features) so y = x @ W + b)."""
    ks = jax.random.split(key, 6)
    scale = 0.05
    w1 = scale * jax.random.normal(ks[0], (state_dim + action_dim, H1), jnp.float32)
    b1 = scale * jax.random.normal(ks[1], (1, H1), jnp.float32)
    w2 = scale * jax.random.normal(ks[2], (H1, H2), jnp.float32)
    b2 = scale * jax.random.normal(ks[3], (1, H2), jnp.float32)
    w3 = scale * jax.random.normal(ks[4], (H2, 1), jnp.float32)
    b3 = scale * jax.random.normal(ks[5], (1, 1), jnp.float32)
    return (w1, b1, w2, b2, w3, b3)


def pad_params_for_kernel(params):
    """Zero-pad hidden dims to lane multiples (exact) and cast the matmul
    weights to bf16 (MXU-native); biases and w3 stay f32 for the VPU path."""
    w1, b1, w2, b2, w3, b3 = params
    K = w1.shape[0]
    w1p = jnp.zeros((K, H1P), jnp.float32).at[:, :H1].set(w1).astype(jnp.bfloat16)
    b1p = jnp.zeros((1, H1P), jnp.float32).at[:, :H1].set(b1)
    w2p = jnp.zeros((H1P, H2P), jnp.float32).at[:H1, :H2].set(w2).astype(jnp.bfloat16)
    b2p = jnp.zeros((1, H2P), jnp.float32).at[:, :H2].set(b2)
    w3p = jnp.zeros((1, H2P), jnp.float32).at[:, :H2].set(w3.T)  # row vec for VPU reduce
    return (w1p, b1p, w2p, b2p, w3p, b3)


def reference_forward(x, u, params):
    w1, b1, w2, b2, w3, b3 = params
    xu = jnp.concatenate([x, u], axis=1)
    h1 = jax.nn.relu(xu @ w1 + b1)
    h2 = jax.nn.relu(h1 @ w2 + b2)
    return h2 @ w3 + b3


if __name__ == "__main__":
    state_dim, action_dim, batch = 16, 8, 8

    key = jax.random.PRNGKey(0)
    kx, ku, kp = jax.random.split(key, 3)
    x = jax.random.normal(kx, (batch, state_dim), jnp.float32)
    u = jax.random.normal(ku, (batch, action_dim), jnp.float32)
    params = init_params(kp, state_dim, action_dim)
    kernel_params = pad_params_for_kernel(params)

    q = critic_forward(x, u, kernel_params)
    q = jax.block_until_ready(q)

    q_ref = reference_forward(x, u, params)
    assert q.shape == (batch, 1)
    assert q.dtype == jnp.float32
    # bf16 matmul operands (f32 accumulation) vs the pure-f32 reference:
    # tolerance loosened accordingly (per the perf-review correctness note).
    assert jnp.allclose(q, q_ref, atol=3e-2, rtol=3e-2), (q, q_ref)

    print("KERNEL_OK")
</pallas_src>

<mosaic_0001>
module attributes {stable_mosaic.version = 11 : i64} {
  func.func @critic_kernel(%arg0: i32, %arg1: memref<8x24xbf16, #tpu.memory_space<vmem>>, %arg2: memref<24x512xbf16, #tpu.memory_space<vmem>>, %arg3: memref<1x512xf32, #tpu.memory_space<vmem>>, %arg4: memref<512x384xbf16, #tpu.memory_space<vmem>>, %arg5: memref<1x384xf32, #tpu.memory_space<vmem>>, %arg6: memref<1x384xf32, #tpu.memory_space<vmem>>, %arg7: memref<1x1xf32, #tpu.memory_space<smem>>, %arg8: memref<8x1xf32, #tpu.memory_space<vmem>>) attributes {dimension_semantics = [#tpu.dimension_semantics<parallel>], iteration_bounds = array<i64: 1>, scalar_prefetch = 0 : i64, scratch_operands = 0 : i64, tpu.core_type = #tpu.core_type<tc>, window_params = [{transform_indices = @transform_0, window_bounds = array<i64: 8, 24>}, {pipeline_mode = #tpu.pipeline_mode<synchronous>, transform_indices = @transform_1, window_bounds = array<i64: 24, 512>}, {pipeline_mode = #tpu.pipeline_mode<synchronous>, transform_indices = @transform_2, window_bounds = array<i64: 1, 512>}, {pipeline_mode = #tpu.pipeline_mode<synchronous>, transform_indices = @transform_3, window_bounds = array<i64: 512, 384>}, {pipeline_mode = #tpu.pipeline_mode<synchronous>, transform_indices = @transform_4, window_bounds = array<i64: 1, 384>}, {pipeline_mode = #tpu.pipeline_mode<synchronous>, transform_indices = @transform_5, window_bounds = array<i64: 1, 384>}, {transform_indices = @transform_6, window_bounds = array<i64: 1, 1>}, {transform_indices = @transform_7, window_bounds = array<i64: 8, 1>}]} {
    %c0 = arith.constant 0 : index
    %c0_0 = arith.constant 0 : index
    %0 = vector.load %arg1[%c0, %c0_0] : memref<8x24xbf16, #tpu.memory_space<vmem>>, vector<8x24xbf16>
    %c0_1 = arith.constant 0 : index
    %c0_2 = arith.constant 0 : index
    %1 = vector.load %arg2[%c0_1, %c0_2] : memref<24x512xbf16, #tpu.memory_space<vmem>>, vector<24x512xbf16>
    %cst = arith.constant dense<0.000000e+00> : vector<8x512xf32>
    %2 = tpu.matmul %0, %1, %cst {dimension_numbers = #tpu.dot_dimension_numbers<[1], [0], [0], [1], [0, 0, 1, 1], [], []>} : vector<8x24xbf16>, vector<24x512xbf16>, vector<8x512xf32> -> vector<8x512xf32>
    %c0_3 = arith.constant 0 : index
    %c0_4 = arith.constant 0 : index
    %3 = vector.load %arg3[%c0_3, %c0_4] : memref<1x512xf32, #tpu.memory_space<vmem>>, vector<1x512xf32>
    %4 = vector.broadcast %3 : vector<1x512xf32> to vector<8x512xf32>
    %5 = arith.addf %2, %4 : vector<8x512xf32>
    %cst_5 = arith.constant 0.000000e+00 : f32
    %6 = vector.broadcast %cst_5 : f32 to vector<8x512xf32>
    %7 = arith.maximumf %5, %6 : vector<8x512xf32>
    %8 = arith.truncf %7 : vector<8x512xf32> to vector<8x512xbf16>
    %c0_6 = arith.constant 0 : index
    %c0_7 = arith.constant 0 : index
    %9 = vector.load %arg4[%c0_6, %c0_7] : memref<512x384xbf16, #tpu.memory_space<vmem>>, vector<512x384xbf16>
    %cst_8 = arith.constant dense<0.000000e+00> : vector<8x384xf32>
    %10 = tpu.matmul %8, %9, %cst_8 {dimension_numbers = #tpu.dot_dimension_numbers<[1], [0], [0], [1], [0, 0, 1, 1], [], []>} : vector<8x512xbf16>, vector<512x384xbf16>, vector<8x384xf32> -> vector<8x384xf32>
    %c0_9 = arith.constant 0 : index
    %c0_10 = arith.constant 0 : index
    %11 = vector.load %arg5[%c0_9, %c0_10] : memref<1x384xf32, #tpu.memory_space<vmem>>, vector<1x384xf32>
    %12 = vector.broadcast %11 : vector<1x384xf32> to vector<8x384xf32>
    %13 = arith.addf %10, %12 : vector<8x384xf32>
    %cst_11 = arith.constant 0.000000e+00 : f32
    %14 = vector.broadcast %cst_11 : f32 to vector<8x384xf32>
    %15 = arith.maximumf %13, %14 : vector<8x384xf32>
    %c0_12 = arith.constant 0 : index
    %c0_13 = arith.constant 0 : index
    %16 = vector.load %arg6[%c0_12, %c0_13] : memref<1x384xf32, #tpu.memory_space<vmem>>, vector<1x384xf32>
    %17 = vector.broadcast %16 : vector<1x384xf32> to vector<8x384xf32>
    %18 = arith.mulf %15, %17 : vector<8x384xf32>
    %cst_14 = arith.constant dense<0.000000e+00> : vector<8xf32>
    %19 = vector.multi_reduction <add>, %18, %cst_14 [1] : vector<8x384xf32> to vector<8xf32>
    %20 = vector.shape_cast %19 : vector<8xf32> to vector<8x1xf32>
    %c0_15 = arith.constant 0 : index
    %c0_16 = arith.constant 0 : index
    %21 = memref.load %arg7[%c0_15, %c0_16] : memref<1x1xf32, #tpu.memory_space<smem>>
    %22 = vector.broadcast %21 : f32 to vector<8x1xf32>
    %23 = arith.addf %20, %22 : vector<8x1xf32>
    %c0_17 = arith.constant 0 : index
    %c0_18 = arith.constant 0 : index
    %24 = vector.load %arg8[%c0_17, %c0_18] : memref<8x1xf32, #tpu.memory_space<vmem>>, vector<8x1xf32>
    tpu.vector_store %arg8[%c0_17, %c0_18], %23 {strides = array<i32>} : memref<8x1xf32, #tpu.memory_space<vmem>>, vector<8x1xf32>,
    return
  }
  func.func @transform_0(%arg0: i32) -> (i32, i32) {
    %c0_i32 = arith.constant 0 : i32
    %c0_i32_0 = arith.constant 0 : i32
    return %arg0, %c0_i32 : i32, i32
  }
  func.func @transform_1(%arg0: i32) -> (i32, i32) {
    %c0_i32 = arith.constant 0 : i32
    %c0_i32_0 = arith.constant 0 : i32
    %c0_i32_1 = arith.constant 0 : i32
    return %c0_i32, %c0_i32_0 : i32, i32
  }
  func.func @transform_2(%arg0: i32) -> (i32, i32) {
    %c0_i32 = arith.constant 0 : i32
    %c0_i32_0 = arith.constant 0 : i32
    %c0_i32_1 = arith.constant 0 : i32
    return %c0_i32, %c0_i32_0 : i32, i32
  }
  func.func @transform_3(%arg0: i32) -> (i32, i32) {
    %c0_i32 = arith.constant 0 : i32
    %c0_i32_0 = arith.constant 0 : i32
    %c0_i32_1 = arith.constant 0 : i32
    return %c0_i32, %c0_i32_0 : i32, i32
  }
  func.func @transform_4(%arg0: i32) -> (i32, i32) {
    %c0_i32 = arith.constant 0 : i32
    %c0_i32_0 = arith.constant 0 : i32
    %c0_i32_1 = arith.constant 0 : i32
    return %c0_i32, %c0_i32_0 : i32, i32
  }
  func.func @transform_5(%arg0: i32) -> (i32, i32) {
    %c0_i32 = arith.constant 0 : i32
    %c0_i32_0 = arith.constant 0 : i32
    %c0_i32_1 = arith.constant 0 : i32
    return %c0_i32, %c0_i32_0 : i32, i32
  }
  func.func @transform_6(%arg0: i32) -> (i32, i32) {
    %c0_i32 = arith.constant 0 : i32
    %c0_i32_0 = arith.constant 0 : i32
    %c0_i32_1 = arith.constant 0 : i32
    return %c0_i32, %c0_i32_0 : i32, i32
  }
  func.func @transform_7(%arg0: i32) -> (i32, i32) {
    %c0_i32 = arith.constant 0 : i32
    %c0_i32_0 = arith.constant 0 : i32
    return %arg0, %c0_i32 : i32, i32
  }
}

</mosaic_0001>

<bundles_post_ra>
// kernel: tpu_custom_call.1
= control target key start
LH: loop header
LB: loop body
LE: loop exit
PB: predicated region body
PF: predicated region fallthrough
CT: control target
= control target key end

     0   :  { %13 = vsyncpa [#allocation4], 0  ;;  %s1590_s0 = inlined_call_operand.hbm [shape: bf16[8,24], index: 0, kind: input, shape index: {}]   ;;  %s1591_s1 = inlined_call_operand.hbm [shape: bf16[24,512], index: 1, kind: input, shape index: {}]   ;;  %s1592_s2 = inlined_call_operand.vmem [shape: f32[1,512], index: 2, kind: input, shape index: {}]   ;;  %s1593_s3 = inlined_call_operand.hbm [shape: bf16[512,384], index: 3, kind: input, shape index: {}]   ;;  %s1594_s4 = inlined_call_operand.vmem [shape: f32[1,384], index: 4, kind: input, shape index: {}]   ;;  %s1595_s5 = inlined_call_operand.vmem [shape: f32[1,384], index: 5, kind: input, shape index: {}]   ;;  %s1596_s6 = inlined_call_operand.<no memory space> [shape: f32[1,1], index: 6, kind: input, shape index: {}]   ;;  %s1597_s7 = inlined_call_operand.vmem [shape: f32[8,1], index: 7, kind: output, shape index: {}]  }
   0x1   :  { %14 = vsyncpa [#allocation6], 0  ;;  %s1464_s24 = smov [#allocation5]   ;;  %s1394_s28 = scalar_lea.hbm %s1591_s1, 768 }
   0x2   :  { %s30_s25 = sshll.u32 %s1464_s24, 4  ;;  %p1395_p0 = scmp.ne.s32.totalorder %s1591_s1, %s1394_s28  ;;  %s31_s25 = int_to_ptr.vmem [resolvable:$true] %s30_s25 }
   0x3   :  { %p1398_p1 = scmp.lt.u32.totalorder %s1394_s28, %s1591_s1 }
   0x5   :  { %p1400_p2 = pnand %p1398_p1, %p1395_p0 }
   0x7   :  { %1403 = shalt.err (!%p1400_p2)
}
   0x8   :  { %s1404_s10 = scalar_lea.vmem %s31_s25, 768  ;;  %p1409_p4 = scmp.lt.s32.totalorder %s31_s25, %s31_s25 }
   0x9   :  { %p1405_p3 = scmp.ne.s32.totalorder %s31_s25, %s1404_s10  ;;  %p1410_p5 = scmp.lt.s32.totalorder %s1404_s10, %s1404_s10 }
   0xb   :  { %p1411_p6 = por %p1410_p5, %p1409_p4 }
   0xd   :  { %p1412_p7 = pnand %p1411_p6, %p1405_p3 }
   0xf   :  { %1415 = shalt.err (!%p1412_p7)
}
  0x10   :  { %s1465_s11 = smov 256   ;;  %s1466_s12 = smov 16  }
  0x11   :  { %36 = dma.hbm_to_vmem [thread:$0]  %s1591_s1, 768, %s31_s25, [#allocation6], %s1465_s11, %s1465_s11, %s1466_s12  }
  0x12   :  { %s1467_s15 = smov [#allocation3]   ;;  %s1468_s17 = smov [#allocation7]  }
  0x13   :  { %s21_s16 = sshll.u32 %s1467_s15, 4  ;;  %s44_s18 = sshll.u32 %s1468_s17, 4  ;;  %s22_s16 = int_to_ptr.vmem [resolvable:$true] %s21_s16  ;;  %s45_s18 = int_to_ptr.vmem [resolvable:$true] %s44_s18 }
  0x14   :  { %s1416_s21 = scalar_lea.hbm %s1590_s0, 64 }
  0x15   :  { %p1417_p8 = scmp.ne.s32.totalorder %s1590_s0, %s1416_s21  ;;  %p1420_p9 = scmp.lt.u32.totalorder %s1416_s21, %s1590_s0 }
  0x17   :  { %p1422_p10 = pnand %p1420_p9, %p1417_p8 }
  0x19   :  { %1425 = shalt.err (!%p1422_p10)
}
  0x1a   :  { %s1426_s1 = scalar_lea.vmem %s22_s16, 64  ;;  %p1431_p12 = scmp.lt.s32.totalorder %s22_s16, %s22_s16 }
  0x1b   :  { %p1427_p11 = scmp.ne.s32.totalorder %s22_s16, %s1426_s1  ;;  %p1432_p13 = scmp.lt.s32.totalorder %s1426_s1, %s1426_s1 }
  0x1d   :  { %p1433_p0 = por %p1432_p13, %p1431_p12 }
  0x1f   :  { %p1434_p1 = pnand %p1433_p0, %p1427_p11 }
  0x21   :  { %1437 = shalt.err (!%p1434_p1)
}
  0x22   :  { %24 = dma.hbm_to_vmem [thread:$0]  %s1590_s0, 64, %s22_s16, [#allocation4]  }
  0x23   :  { %s1438_s30 = scalar_lea.hbm %s1593_s3, 12288 }
  0x24   :  { %p1439_p2 = scmp.ne.s32.totalorder %s1593_s3, %s1438_s30  ;;  %p1442_p3 = scmp.lt.u32.totalorder %s1438_s30, %s1593_s3 }
  0x26   :  { %p1444_p4 = pnand %p1442_p3, %p1439_p2 }
  0x28   :  { %1447 = shalt.err (!%p1444_p4)
}
  0x29   :  { %s1448_s12 = scalar_lea.vmem %s45_s18, 12288  ;;  %p1453_p6 = scmp.lt.s32.totalorder %s45_s18, %s45_s18 }
  0x2a   :  { %p1449_p5 = scmp.ne.s32.totalorder %s45_s18, %s1448_s12  ;;  %p1454_p7 = scmp.lt.s32.totalorder %s1448_s12, %s1448_s12 }
  0x2c   :  { %p1455_p8 = por %p1454_p7, %p1453_p6 }
  0x2e   :  { %p1456_p9 = pnand %p1455_p8, %p1449_p5 }
  0x30   :  { %1459 = shalt.err (!%p1456_p9)
}
  0x31   :  { %s1469_s0 = smov 192   ;;  %s1470_s13 = smov 12  }
  0x32   :  { %50 = dma.hbm_to_vmem [thread:$0]  %s1593_s3, 12288, %s45_s18, [#allocation6], %s1469_s0, %s1469_s0, %s1470_s13  }
  0x33   :  { %1460 = dma.done.wait [#allocation4], 64  }
  0x34   :  { %1461 = vsyncadd [#allocation4], 4294967232 }
  0x35   :  { %1462 = dma.done.wait [#allocation6], 13056  }
  0x36   :  { %1463 = vsyncadd [#allocation6], 4294954240  ;;  %v1471_v0 = vmov 0   ;;  %v1256_v1 = vld [vmem:[#allocation5 + $0x4] ss:$16 sps:$4 sm:$0xff]   ;;  %vm130_vm0 = vcmask 1043456  }
  0x37   :  { %175 = vmatprep.mubr.bf16.mxu1 %v1471_v0  ;;  %v1258_v2 = vld [vmem:[#allocation5] ss:$16 sps:$4 sm:$0xff]   ;;  %143 = vmatprep.subr.bf16.mxu1 %v1256_v1  ;;  %v1263_v6 = vld [vmem:[#allocation5 + $0xc] ss:$16 sps:$4 sm:$0xff]   ;;  %vm126_vm1 = vcmask 195584   ;;  %vm1082_vm2 = vcmask 7168  }
  0x38   :  { %v72_v3 = vld [vmem:[#allocation5 + $0x20] sm:$0xff]  ;;  %144 = vmatpush1.bf16.msra.mxu1 %v1258_v2  ;;  %v73_v7 = vld [vmem:[#allocation5 + $0x28] sm:$0xff]  ;;  %v1268_v10 = vld [vmem:[#allocation7] ss:$12 sps:$4 sm:$0xff]  }
  0x39   :  { %v1095_v4 = vcombine.high %v72_v3, %v72_v3  ;;  %v1094_v5 = vcombine.low %v72_v3, %v72_v3  ;;  %v1266_v9 = vld [vmem:[#allocation7 + $0x4] ss:$12 sps:$4 sm:$0xff]   ;;  %v1269_v11 = vld [vmem:[#allocation7 + $0x1c] ss:$12 sps:$4 sm:$0xff]   ;;  %v67_v12 = vld [vmem:[#allocation3] sm:$0xf]  ;;  %v1097_v14 = vcombine.high %v73_v7, %v73_v7  ;;  %v1096_v15 = vcombine.low %v73_v7, %v73_v7 }
  0x3a   :  { %890 = vmatprep.subr.bf16.mxu0 %v1266_v9  ;;  %v1261_v13 = vld [vmem:[#allocation5 + $0x8] ss:$16 sps:$4 sm:$0xff]   ;;  %v1272_v17 = vld [vmem:[#allocation7 + $0x34] ss:$12 sps:$4 sm:$0xff]   ;;  %v1274_v19 = vld [vmem:[#allocation7 + $0x30] ss:$12 sps:$4 sm:$0xff]  }
  0x3b   :  { %1098 = vmatprep.subr.msk.bf16.mxu1 %vm130_vm0, %v1095_v4  ;;  %v132_v8 = vsel %vm130_vm0, %v1094_v5, 0  ;;  %891 = vmatpush1.bf16.msra.mxu0 %v1268_v10  ;;  %v1271_v16 = vld [vmem:[#allocation7 + $0x18] ss:$12 sps:$4 sm:$0xff]   ;;  %v138_v18 = vsel %vm130_vm0, %v1096_v15, 0  ;;  %v1277_v21 = vld [vmem:[#allocation7 + $0x48] ss:$12 sps:$4 sm:$0xff]  }
  0x3c   :  { %146 = vmatpush1.bf16.msra.mxu1 %v132_v8  ;;  %892 = vmatprep.subr.bf16.mxu0 %v1269_v11  ;;  %v1275_v20 = vld [vmem:[#allocation7 + $0x4c] ss:$12 sps:$4 sm:$0xff]   ;;  %v1278_v22 = vld [vmem:[#allocation7 + $0x64] ss:$12 sps:$4 sm:$0xff]   ;;  %v1292_v23 = vld [vmem:[#allocation7 + $0xc8] ss:$12 sps:$4 sm:$0xff]  }
  0x3d   :  { %184 = vmatprep.subr.bf16.mxu1 %v1263_v6  ;;  %v1294_v24 = vld [vmem:[#allocation7 + $0x8] ss:$12 sps:$4 sm:$0xff]   ;;  %v1280_v25 = vld [vmem:[#allocation7 + $0x60] ss:$12 sps:$4 sm:$0xff]   ;;  %v1302_v29 = vld [vmem:[#allocation7 + $0xf8] ss:$12 sps:$4 sm:$0xff]  }
  0x3e   :  { %v1297_v26 = vld [vmem:[#allocation7 + $0xe0] ss:$12 sps:$4 sm:$0xff]   ;;  %v1281_v28 = vld [vmem:[#allocation7 + $0x7c] ss:$12 sps:$4 sm:$0xff]   ;;  %v1283_v30 = vld [vmem:[#allocation7 + $0x78] ss:$12 sps:$4 sm:$0xff]  }
  0x3f   :  { %1099 = vmatmul.mubr.msk.bf16.vlgmr.msra.gmra.mrb[0].mxu1 %vm126_vm1, %v67_v12  ;;  %893 = vmatpush1.bf16.msra.mxu0 %v1271_v16  ;;  %v1299_v27 = vld [vmem:[#allocation7 + $0x20] ss:$12 sps:$4 sm:$0xff]   ;;  %v1304_v31 = vld [vmem:[#allocation7 + $0x38] ss:$12 sps:$4 sm:$0xff]   ;;  %v1307_v33 = vld [vmem:[#allocation7 + $0x110] ss:$12 sps:$4 sm:$0xff]  }
  0x40   :  { %185 = vmatpush1.bf16.msra.mxu1 %v1261_v13  ;;  %216 = vmatprep.mubr.bf16.mxu1 %v1471_v0  ;;  %v1284_v32 = vld [vmem:[#allocation7 + $0x94] ss:$12 sps:$4 sm:$0xff]   ;;  %v1309_v34 = vld [vmem:[#allocation7 + $0x50] ss:$12 sps:$4 sm:$0xff]   ;;  %v1287_v36 = vld [vmem:[#allocation7 + $0xac] ss:$12 sps:$4 sm:$0xff]   ;;  %v76_v0 = vlaneseq }
  0x41   :  { %1100 = vmatprep.subr.msk.bf16.mxu1 %vm130_vm0, %v1097_v14  ;;  %894 = vmatprep.subr.bf16.mxu0 %v1272_v17  ;;  %v1286_v35 = vld [vmem:[#allocation7 + $0x90] ss:$12 sps:$4 sm:$0xff]   ;;  %v1312_v37 = vld [vmem:[#allocation7 + $0x128] ss:$12 sps:$4 sm:$0xff]   ;;  %v1317_v40 = vld [vmem:[#allocation7 + $0x140] ss:$12 sps:$4 sm:$0xff]  }
  0x42   :  { %v1289_v38 = vld [vmem:[#allocation7 + $0xa8] ss:$12 sps:$4 sm:$0xff]   ;;  %v1290_v41 = vld [vmem:[#allocation7 + $0xc4] ss:$12 sps:$4 sm:$0xff]   ;;  %v1293_v42 = vld [vmem:[#allocation7 + $0xc0] ss:$12 sps:$4 sm:$0xff]  }
  0x43   :  { %895 = vmatpush1.bf16.msra.mxu0 %v1274_v19  ;;  %v1314_v39 = vld [vmem:[#allocation7 + $0x68] ss:$12 sps:$4 sm:$0xff]   ;;  %v1319_v43 = vld [vmem:[#allocation7 + $0x80] ss:$12 sps:$4 sm:$0xff]   ;;  %v1298_v45 = vld [vmem:[#allocation7 + $0xd8] ss:$12 sps:$4 sm:$0xff]  }
  0x44   :  { %187 = vmatpush1.bf16.msra.mxu1 %v138_v18  ;;  %896 = vmatprep.subr.bf16.mxu0 %v1275_v20  ;;  %v1295_v44 = vld [vmem:[#allocation7 + $0xdc] ss:$12 sps:$4 sm:$0xff]   ;;  %v1300_v46 = vld [vmem:[#allocation7 + $0xf4] ss:$12 sps:$4 sm:$0xff]   ;;  %v1305_v48 = vld [vmem:[#allocation7 + $0x10c] ss:$12 sps:$4 sm:$0xff]  }
  0x45   :  { %1198 = vmatprep.subr.bf16.mxu1 %v1292_v23  ;;  %v1303_v47 = vld [vmem:[#allocation7 + $0xf0] ss:$12 sps:$4 sm:$0xff]   ;;  %v1308_v49 = vld [vmem:[#allocation7 + $0x108] ss:$12 sps:$4 sm:$0xff]   ;;  %v1313_v51 = vld [vmem:[#allocation7 + $0x120] ss:$12 sps:$4 sm:$0xff]  }
  0x46   :  { %v1310_v50 = vld [vmem:[#allocation7 + $0x124] ss:$12 sps:$4 sm:$0xff]   ;;  %v1315_v52 = vld [vmem:[#allocation7 + $0x13c] ss:$12 sps:$4 sm:$0xff]   ;;  %v1320_v54 = vld [vmem:[#allocation7 + $0x154] ss:$12 sps:$4 sm:$0xff]  }
  0x47   :  { %1101 = vmatmul.mubr.msk.bf16.vlgmr.msra.gmra.mrb[4].mxu1 %vm126_vm1, %v67_v12  ;;  %897 = vmatpush1.bf16.msra.mxu0 %v1277_v21  ;;  %v1318_v53 = vld [vmem:[#allocation7 + $0x138] ss:$12 sps:$4 sm:$0xff]   ;;  %v1323_v56 = vld [vmem:[#allocation7 + $0x150] ss:$12 sps:$4 sm:$0xff]   ;;  %v1328_v60 = vld [vmem:[#allocation7 + $0x168] ss:$12 sps:$4 sm:$0xff]  }
  0x48   :  { %1199 = vmatpush3.bf16.msra.mxu1 %v1294_v24  ;;  %898 = vmatprep.subr.bf16.mxu0 %v1278_v22  ;;  %v1322_v55 = vld [vmem:[#allocation7 + $0x158] ss:$12 sps:$4 sm:$0xff]   ;;  %v1327_v59 = vld [vmem:[#allocation7 + $0x170] ss:$12 sps:$4 sm:$0xff]   ;;  %v1333_v63 = vld [vmem:[#allocation7 + $0x248] ss:$12 sps:$4 sm:$0xff]  }
  0x49   :  { %1200 = vmatprep.subr.bf16.mxu1 %v1297_v26  ;;  %v1324_v57 = vld [vmem:[#allocation7 + $0x98] ss:$12 sps:$4 sm:$0xff]   ;;  %v1329_v61 = vld [vmem:[#allocation7 + $0xb0] ss:$12 sps:$4 sm:$0xff]   ;;  %v77_v1 = vshrl.u32 %v76_v0, 7 }
  0x4a   :  { %v1325_v58 = vld [vmem:[#allocation7 + $0x16c] ss:$12 sps:$4 sm:$0xff]   ;;  %v1332_v62 = vld [vmem:[#allocation7 + $0x184] ss:$12 sps:$4 sm:$0xff]   ;;  %v1334_v18 = vld [vmem:[#allocation7 + $0x188] ss:$12 sps:$4 sm:$0xff]  }
  0x4b   :  { %899 = vmatpush1.bf16.msra.mxu0 %v1280_v25  ;;  %v1554_v2 = vsub.s32 0, %v77_v1  ;;  %v1559_v3 = vld [vmem:[%s1592_s2] sm:$0xf]  ;;  %v1561_v4 = vsub.s32 1, %v77_v1  ;;  %v90_v12 = vsub.s32 3, %v77_v1 }
  0x4c   :  { %1201 = vmatpush3.bf16.msra.mxu1 %v1299_v27  ;;  %900 = vmatprep.subr.bf16.mxu0 %v1281_v28  ;;  %v1330_v17 = vld [vmem:[#allocation7 + $0x180] ss:$12 sps:$4 sm:$0xff]   ;;  %v1337_v21 = vld [vmem:[#allocation7 + $0x19c] ss:$12 sps:$4 sm:$0xff]   ;;  %v1335_v25 = vld [vmem:[#allocation7 + $0x198] ss:$12 sps:$4 sm:$0xff]  }
  0x4d   :  { %1202 = vmatprep.subr.bf16.mxu1 %v1302_v29  ;;  %v79_v5 = vrot.slane %v1559_v3, %v1554_v2  ;;  %v83_v6 = vrot.slane %v1559_v3, %v1561_v4  ;;  %v91_v19 = vrot.slane %v1559_v3, %v90_v12  ;;  %v1338_v22 = vld [vmem:[#allocation7 + $0x260] ss:$12 sps:$4 sm:$0xff]   ;;  %v1373_v0 = vld [vmem:[#allocation7 + $0x258] ss:$12 sps:$4 sm:$0xff]   ;;  %v1388_v12 = vld [vmem:[#allocation7 + $0x2d0] ss:$12 sps:$4 sm:$0xff]  }
  0x4e   :  { %v1339_v26 = vld [vmem:[#allocation7 + $0x1a0] ss:$12 sps:$4 sm:$0xff]  }
  0x4f   :  { %901 = vmatpush1.bf16.msra.mxu0 %v1283_v30  ;;  %v1342_v29 = vld [vmem:[#allocation7 + $0x1b4] ss:$12 sps:$4 sm:$0xff]   ;;  %v1343_v30 = vld [vmem:[#allocation7 + $0x278] ss:$12 sps:$4 sm:$0xff]  }
  0x50   :  { %1203 = vmatpush3.bf16.msra.mxu1 %v1304_v31  ;;  %902 = vmatprep.subr.bf16.mxu0 %v1284_v32 }
  0x51   :  { %1204 = vmatprep.subr.bf16.mxu1 %v1307_v33  ;;  %v1340_v33 = vld [vmem:[#allocation7 + $0x1b0] ss:$12 sps:$4 sm:$0xff]  }
  0x53   :  { %903 = vmatpush1.bf16.msra.mxu0 %v1286_v35 }
  0x54   :  { %1205 = vmatpush3.bf16.msra.mxu1 %v1309_v34  ;;  %904 = vmatprep.subr.bf16.mxu0 %v1287_v36  ;;  %v1344_v34 = vld [vmem:[#allocation7 + $0x1b8] ss:$12 sps:$4 sm:$0xff]  }
  0x55   :  { %1206 = vmatprep.subr.bf16.mxu1 %v1312_v37  ;;  %v1347_v36 = vld [vmem:[#allocation7 + $0x1cc] ss:$12 sps:$4 sm:$0xff]   ;;  %v1348_v37 = vld [vmem:[#allocation7 + $0x290] ss:$12 sps:$4 sm:$0xff]  }
  0x57   :  { %905 = vmatpush1.bf16.msra.mxu0 %v1289_v38  ;;  %v1345_v38 = vld [vmem:[#allocation7 + $0x1c8] ss:$12 sps:$4 sm:$0xff]  }
  0x58   :  { %1207 = vmatpush3.bf16.msra.mxu1 %v1314_v39  ;;  %906 = vmatprep.subr.bf16.mxu0 %v1290_v41  ;;  %v1349_v39 = vld [vmem:[#allocation7 + $0x1d0] ss:$12 sps:$4 sm:$0xff]   ;;  %v1353_v41 = vld [vmem:[#allocation7 + $0x2a8] ss:$12 sps:$4 sm:$0xff]  }
  0x59   :  { %1208 = vmatprep.subr.bf16.mxu1 %v1317_v40  ;;  %v1352_v40 = vld [vmem:[#allocation7 + $0x1e4] ss:$12 sps:$4 sm:$0xff]  }
  0x5b   :  { %907 = vmatpush1.bf16.msra.mxu0 %v1293_v42  ;;  %v1568_v42 = vsub.s32 2, %v77_v1  ;;  %v1378_v1 = vld [vmem:[#allocation7 + $0x274] ss:$12 sps:$4 sm:$0xff]  }
  0x5c   :  { %1209 = vmatpush3.bf16.msra.mxu1 %v1319_v43  ;;  %908 = vmatprep.subr.bf16.mxu0 %v1295_v44  ;;  %v1350_v43 = vld [vmem:[#allocation7 + $0x1e0] ss:$12 sps:$4 sm:$0xff]   ;;  %v1354_v44 = vld [vmem:[#allocation7 + $0x1e8] ss:$12 sps:$4 sm:$0xff]  }
  0x5d   :  { %1210 = vmatprep.subr.bf16.mxu1 %v1322_v55  ;;  %v1367_v55 = vld [vmem:[#allocation7 + $0x22c] ss:$12 sps:$4 sm:$0xff]  }
  0x5f   :  { %909 = vmatpush1.bf16.msra.mxu0 %v1298_v45  ;;  %v1357_v45 = vld [vmem:[#allocation7 + $0x1fc] ss:$12 sps:$4 sm:$0xff]  }
  0x60   :  { %910 = vmatprep.subr.bf16.mxu0 %v1300_v46  ;;  %1211 = vmatpush3.bf16.msra.mxu1 %v1324_v57  ;;  %v1358_v46 = vld [vmem:[#allocation7 + $0x2c0] ss:$12 sps:$4 sm:$0xff]  }
  0x61   :  { %1212 = vmatprep.subr.bf16.mxu1 %v1327_v59  ;;  %v1369_v59 = vld [vmem:[#allocation7 + $0x230] ss:$12 sps:$4 sm:$0xff]  }
  0x63   :  { %911 = vmatpush1.bf16.msra.mxu0 %v1303_v47  ;;  %v87_v47 = vrot.slane %v1559_v3, %v1568_v42  ;;  %v1376_v3 = vld [vmem:[#allocation7 + $0x270] ss:$12 sps:$4 sm:$0xff]  }
  0x64   :  { %912 = vmatprep.subr.bf16.mxu0 %v1305_v48  ;;  %1213 = vmatpush3.bf16.msra.mxu1 %v1329_v61  ;;  %v1355_v48 = vld [vmem:[#allocation7 + $0x1f8] ss:$12 sps:$4 sm:$0xff]  }
  0x65   :  { %1220 = vmatprep.subr.bf16.mxu1 %v1333_v63  ;;  %v1375_v63 = vld [vmem:[#allocation7 + $0x25c] ss:$12 sps:$4 sm:$0xff]  }
  0x67   :  { %913 = vmatpush1.bf16.msra.mxu0 %v1308_v49  ;;  %v1359_v49 = vld [vmem:[#allocation7 + $0x200] ss:$12 sps:$4 sm:$0xff]  }
  0x68   :  { %914 = vmatprep.subr.bf16.mxu0 %v1310_v50  ;;  %v1362_v50 = vld [vmem:[#allocation7 + $0x214] ss:$12 sps:$4 sm:$0xff]  }
  0x6b   :  { %915 = vmatpush1.bf16.msra.mxu0 %v1313_v51  ;;  %v1363_v51 = vld [vmem:[#allocation7 + $0x2d8] ss:$12 sps:$4 sm:$0xff]  }
  0x6c   :  { %916 = vmatprep.subr.bf16.mxu0 %v1315_v52 }
  0x6f   :  { %917 = vmatpush1.bf16.msra.mxu0 %v1318_v53  ;;  %v1360_v53 = vld [vmem:[#allocation7 + $0x210] ss:$12 sps:$4 sm:$0xff]  }
  0x70   :  { %918 = vmatprep.subr.bf16.mxu0 %v1320_v54  ;;  %v1364_v54 = vld [vmem:[#allocation7 + $0x218] ss:$12 sps:$4 sm:$0xff]  }
  0x73   :  { %919 = vmatpush1.bf16.msra.mxu0 %v1323_v56  ;;  %v1368_v56 = vld [vmem:[#allocation7 + $0x2f0] ss:$12 sps:$4 sm:$0xff]  }
  0x74   :  { %920 = vmatprep.subr.bf16.mxu0 %v1325_v58  ;;  %v1365_v58 = vld [vmem:[#allocation7 + $0x228] ss:$12 sps:$4 sm:$0xff]  }
  0x77   :  { %921 = vmatpush1.bf16.msra.mxu0 %v1328_v60  ;;  %v1372_v60 = vld [vmem:[#allocation7 + $0x244] ss:$12 sps:$4 sm:$0xff]  }
  0x78   :  { %931 = vmatprep.subr.bf16.mxu0 %v1332_v62  ;;  %v1370_v62 = vld [vmem:[#allocation7 + $0x240] ss:$12 sps:$4 sm:$0xff]  }
 0x112   :  { %v177_v7 = vpop.f32.mrb[0].mxu1 }
 0x113   :  { %v178_v8 = vadd.f32 %v177_v7, %v79_v5  ;;  %v179_v9 = vpop.f32.mrb[1].mxu1  ;;  %v1381_v5 = vld [vmem:[#allocation7 + $0x28c] ss:$12 sps:$4 sm:$0xff]   ;;  %v1384_v7 = vld [vmem:[#allocation7 + $0x2a4] ss:$12 sps:$4 sm:$0xff]  }
 0x114   :  { %v180_v10 = vadd.f32 %v179_v9, %v83_v6  ;;  %v181_v11 = vpop.f32.mrb[2].mxu1  ;;  %v1379_v6 = vld [vmem:[#allocation7 + $0x288] ss:$12 sps:$4 sm:$0xff]  }
 0x115   :  { %v225_v13 = vmax.f32 %v178_v8, 0.0  ;;  %v182_v14 = vpop.f32.mrb[3].mxu1  ;;  %v1382_v8 = vld [vmem:[#allocation7 + $0x2a0] ss:$12 sps:$4 sm:$0xff]   ;;  %v1387_v9 = vld [vmem:[#allocation7 + $0x2bc] ss:$12 sps:$4 sm:$0xff]  }
 0x116   :  { %v226_v15 = vmax.f32 %v180_v10, 0.0  ;;  %v1385_v10 = vld [vmem:[#allocation7 + $0x2b8] ss:$12 sps:$4 sm:$0xff]   ;;  %v1390_v11 = vld [vmem:[#allocation7 + $0x2d4] ss:$12 sps:$4 sm:$0xff]  }
 0x117   :  { %v229_v20 = vpack.c.bf16 %v225_v13, %v225_v13  ;;  %v1393_v13 = vld [vmem:[#allocation7 + $0x2ec] ss:$12 sps:$4 sm:$0xff]   ;;  %v1391_v14 = vld [vmem:[#allocation7 + $0x2e8] ss:$12 sps:$4 sm:$0xff]  }
 0x118   :  { %v230_v16 = vpack.c.bf16 %v226_v15, %v226_v15 }
 0x11a   :  { %922 = vmatprep.mubr.bf16.mxu0 %v230_v16  ;;  %1004 = vmatprep.mubr.bf16.mxu1 %v230_v16  ;;  %v218_v23 = vpop.f32.mrb[4].mxu1 }
 0x11b   :  { %923 = vmatmul.mubr.bf16.vlgmr.msra.gmra.mrb[0].mxu0 %v229_v20  ;;  %1005 = vmatmul.mubr.bf16.vlgmr.msra.gmra.mrb[8].mxu1 %v229_v20  ;;  %v220_v24 = vpop.f32.mrb[5].mxu1  ;;  %v219_v52 = vadd.f32 %v218_v23, %v87_v47  ;;  %v361_v20 = vld [vmem:[%s1594_s4] sm:$0x7] }
 0x11c   :  { %932 = vmatpush1.bf16.msra.mxu0 %v1330_v17  ;;  %1221 = vmatpush3.bf16.msra.mxu1 %v1334_v18  ;;  %v221_v27 = vadd.f32 %v220_v24, %v91_v19  ;;  %v222_v28 = vpop.f32.mrb[6].mxu1 }
 0x11d   :  { %933 = vmatprep.subr.bf16.mxu0 %v1337_v21  ;;  %1222 = vmatprep.subr.bf16.mxu1 %v1338_v22  ;;  %v223_v31 = vpop.f32.mrb[7].mxu1  ;;  %v227_v57 = vmax.f32 %v219_v52, 0.0  ;;  %v374_v21 = vrot.slane %v361_v20, %v1568_v42 }
 0x11e   :  { %v228_v32 = vmax.f32 %v221_v27, 0.0 }
 0x11f   :  { %v231_v61 = vpack.c.bf16 %v227_v57, %v227_v57 }
 0x120   :  { %934 = vmatpush1.bf16.msra.mxu0 %v1335_v25  ;;  %1223 = vmatpush3.bf16.msra.mxu1 %v1339_v26  ;;  %v232_v35 = vpack.c.bf16 %v228_v32, %v228_v32  ;;  %v1055_v32 = vld [vmem:[%s1595_s5] sm:$0x7] }
 0x121   :  { %935 = vmatprep.subr.bf16.mxu0 %v1342_v29  ;;  %1224 = vmatprep.subr.bf16.mxu1 %v1343_v30  ;;  %v366_v29 = vrot.slane %v361_v20, %v1554_v2  ;;  %v370_v30 = vrot.slane %v361_v20, %v1561_v4 }
 0x122   :  { %1044 = vmatprep.mubr.bf16.mxu1 %v232_v35  ;;  %963 = vmatprep.mubr.bf16.mxu0 %v232_v35 }
 0x124   :  { %936 = vmatpush1.bf16.msra.mxu0 %v1340_v33  ;;  %1225 = vmatpush3.bf16.msra.mxu1 %v1344_v34  ;;  %v1060_v34 = vrot.slane %v1055_v32, %v1554_v2  ;;  %v1080_v2 = vstv %s1596_s6 }
 0x125   :  { %937 = vmatprep.subr.bf16.mxu0 %v1347_v36  ;;  %1226 = vmatprep.subr.bf16.mxu1 %v1348_v37  ;;  %v1064_v37 = vrot.slane %v1055_v32, %v1561_v4 }
 0x128   :  { %938 = vmatpush1.bf16.msra.mxu0 %v1345_v38  ;;  %1227 = vmatpush3.bf16.msra.mxu1 %v1349_v39 }
 0x129   :  { %939 = vmatprep.subr.bf16.mxu0 %v1352_v40  ;;  %1228 = vmatprep.subr.bf16.mxu1 %v1353_v41 }
 0x12c   :  { %940 = vmatpush1.bf16.msra.mxu0 %v1350_v43  ;;  %1229 = vmatpush3.bf16.msra.mxu1 %v1354_v44  ;;  %v1068_v44 = vrot.slane %v1055_v32, %v1568_v42 }
 0x12d   :  { %941 = vmatprep.subr.bf16.mxu0 %v1357_v45  ;;  %1230 = vmatprep.subr.bf16.mxu1 %v1358_v46 }
 0x130   :  { %942 = vmatpush1.bf16.msra.mxu0 %v1355_v48  ;;  %1231 = vmatpush3.bf16.msra.mxu1 %v1359_v49 }
 0x131   :  { %943 = vmatprep.subr.bf16.mxu0 %v1362_v50  ;;  %1232 = vmatprep.subr.bf16.mxu1 %v1363_v51 }
 0x134   :  { %944 = vmatpush1.bf16.msra.mxu0 %v1360_v53  ;;  %1233 = vmatpush3.bf16.msra.mxu1 %v1364_v54 }
 0x135   :  { %945 = vmatprep.subr.bf16.mxu0 %v1367_v55  ;;  %1234 = vmatprep.subr.bf16.mxu1 %v1368_v56 }
 0x138   :  { %946 = vmatpush1.bf16.msra.mxu0 %v1365_v58  ;;  %1235 = vmatpush3.bf16.msra.mxu1 %v1369_v59 }
 0x139   :  { %947 = vmatprep.subr.bf16.mxu0 %v1372_v60 }
 0x13b   :  { %1045 = vmatmul.mubr.bf16.vlgmr.msra.gmra.mrb[12].mxu1 %v231_v61 }
 0x13c   :  { %948 = vmatpush1.bf16.msra.mxu0 %v1370_v62 }
 0x13d   :  { %949 = vmatprep.subr.bf16.mxu0 %v1375_v63 }
 0x140   :  { %950 = vmatpush1.bf16.msra.mxu0 %v1373_v0 }
 0x141   :  { %951 = vmatprep.subr.bf16.mxu0 %v1378_v1 }
 0x144   :  { %952 = vmatpush1.bf16.msra.mxu0 %v1376_v3 }
 0x145   :  { %953 = vmatprep.subr.bf16.mxu0 %v1381_v5 }
 0x148   :  { %954 = vmatpush1.bf16.msra.mxu0 %v1379_v6 }
 0x149   :  { %955 = vmatprep.subr.bf16.mxu0 %v1384_v7 }
 0x14c   :  { %956 = vmatpush1.bf16.msra.mxu0 %v1382_v8 }
 0x14d   :  { %957 = vmatprep.subr.bf16.mxu0 %v1387_v9 }
 0x150   :  { %958 = vmatpush1.bf16.msra.mxu0 %v1385_v10 }
 0x151   :  { %959 = vmatprep.subr.bf16.mxu0 %v1390_v11 }
 0x154   :  { %960 = vmatpush1.bf16.msra.mxu0 %v1388_v12 }
 0x155   :  { %961 = vmatprep.subr.bf16.mxu0 %v1393_v13 }
 0x158   :  { %962 = vmatpush1.bf16.msra.mxu0 %v1391_v14 }
 0x15b   :  { %964 = vmatmul.mubr.bf16.vlgmr.msra.gmra.mrb[0].mxu0 %v231_v61 }
 0x1ee   :  { %v1214_v15 = vpop.f32.mrb[8].mxu1 }
 0x1ef   :  { %v1215_v16 = vpop.f32.mrb[9].mxu1 }
 0x1f0   :  { %v1216_v17 = vadd.f32 %v1215_v16, %v1214_v15  ;;  %v1217_v18 = vpop.f32.mrb[10].mxu1 }
 0x1f1   :  { %v1218_v19 = vpop.f32.mrb[11].mxu1 }
 0x1f2   :  { %v1007_v24 = vadd.f32 %v1216_v17, %v374_v21 }
 0x20e   :  { %v1236_v22 = vpop.f32.mrb[12].mxu1 }
 0x20f   :  { %v1237_v23 = vpop.f32.mrb[13].mxu1 }
 0x210   :  { %v1238_v25 = vadd.f32 %v1237_v23, %v1236_v22  ;;  %v1239_v26 = vpop.f32.mrb[14].mxu1 }
 0x211   :  { %v1240_v27 = vpop.f32.mrb[15].mxu1 }
 0x212   :  { %v1047_v28 = vadd.f32 %v1238_v25, %v1007_v24 }
 0x214   :  { %v1054_v41 = vmax.f32 %v1047_v28, 0.0 }
 0x216   :  { %v1074_v47 = vmul.f32 %v1068_v44, %v1054_v41 }
 0x22e   :  { %v965_v31 = vpop.f32.mrb[0].mxu0 }
 0x22f   :  { %v1242_v33 = vadd.f32 %v965_v31, %v366_v29  ;;  %v967_v35 = vpop.f32.mrb[1].mxu0 }
 0x230   :  { %v1243_v36 = vadd.f32 %v967_v35, %v370_v30  ;;  %v969_v38 = vpop.f32.mrb[2].mxu0 }
 0x231   :  { %v1052_v39 = vmax.f32 %v1242_v33, 0.0  ;;  %v970_v40 = vpop.f32.mrb[3].mxu0 }
 0x232   :  { %v1053_v43 = vmax.f32 %v1243_v36, 0.0 }
 0x233   :  { %v1072_v45 = vmul.f32 %v1060_v34, %v1052_v39 }
 0x234   :  { %v1073_v46 = vmul.f32 %v1064_v37, %v1053_v43 }
 0x236   :  { %v1075_v48 = vadd.f32 %v1073_v46, %v1072_v45 }
 0x238   :  { %v1076_v49 = vadd.f32 %v1075_v48, %v1074_v47 }
 0x23a   :  { %1077 = vadd.xlane.f32.xlu0 %v1076_v49 }
 0x2c7   :  { %v1078_v50 = vpop.xlane.xlu0 %1077 }
 0x2c8   :  { %v1081_v4 = vadd.f32 %v1080_v2, %v1078_v50 }
 0x2ca   :  { %1083 = vst.msk [vmem:[%s1597_s7] sm:$0xff] %vm1082_vm2, %v1081_v4 }
 0x2cb   :  { %1088 = vsyncpa [#allocation4], 1 }
 0x2cc   :  { %1089 = vsyncpa [#allocation6], 1 }

</bundles_post_ra>
